<compile_context>
chip_gen: v6e
topology: v6e:2x2x1
jax: 0.10.0
libtpu: 0.0.40
codegen_flags: <defaults>
</compile_context>

<pallas_src>
import functools

import jax
import jax.numpy as jnp
from jax.experimental import pallas as pl
from jax.experimental.pallas import tpu as pltpu

D_MODEL = 20
NHEAD = 4
DIM_FF = 128
NUM_LAYERS = 6
N_CLASSES = 10
LN_EPS = 1e-5
OUT_LANES = 128          # lane-dense classification-head output width


def _layer_norm(v, g, b):
    mu = jnp.mean(v, axis=-1, keepdims=True)
    d = v - mu
    var = jnp.mean(d * d, axis=-1, keepdims=True)
    return d * jax.lax.rsqrt(var + LN_EPS) * g + b


def transformer_kernel(n, s, nhead,
                       x_ref, hmask_ref, bmask_ref,
                       wsq_ref, w1_ref, w2_ref, vec_ref, b1_ref,
                       wc_ref, bc_ref, out_ref, xs_ref):
    """One encoder layer per grid step; activations persist in xs_ref.

    x_ref:    (N*S, E)        flattened input activations (row = n*S + s)
    hmask_ref:(H*N*S, E)      1.0 where column e belongs to the row's head
    bmask_ref:(H*N*S, N*S)    0.0 same-batch / -1e30 cross-batch additive mask
    wsq_ref:  (4, E, E)       this layer's [WqT*scale, WkT, WvT, WoT]
    w1_ref:   (E, F)  w2_ref: (F, E)   pre-transposed FFN weights
    vec_ref:  (9, 1, E)       [bq*scale, bk, bv, bo, b2, g1, be1, g2, be2]
    b1_ref:   (1, F)
    wc_ref:   (E, 128)  bc_ref: (1, 128)   lane-padded classification head
    out_ref:  (S, 128)
    xs_ref:   (N*S, E) f32    activation carry (VMEM scratch)
    """
    l = pl.program_id(0)
    ns = n * s

    @pl.when(l == 0)
    def _():
        xs_ref[...] = x_ref[...].astype(jnp.float32)

    x = xs_ref[...]
    hmask = hmask_ref[...]

    # ---- multi-head self attention, all batches/heads packed ----
    # (1/sqrt(Dh) is pre-folded into Wq / bq by the wrapper)
    qf = jnp.dot(x, wsq_ref[0], preferred_element_type=jnp.float32) + vec_ref[0]
    kf = jnp.dot(x, wsq_ref[1], preferred_element_type=jnp.float32) + vec_ref[1]
    vf = jnp.dot(x, wsq_ref[2], preferred_element_type=jnp.float32) + vec_ref[2]

    # replicate Q per head along sublanes, mask to that head's columns
    q_rep = jnp.concatenate([qf] * nhead, axis=0) * hmask        # (H*N*S, E)
    sc = jax.lax.dot_general(q_rep, kf, (((1,), (1,)), ((), ())),
                             preferred_element_type=jnp.float32)  # (H*N*S, N*S)
    sc = sc + bmask_ref[...]                 # mask BEFORE the row max
    sc = sc - jnp.max(sc, axis=-1, keepdims=True)
    p = jnp.exp(sc)
    p = p * pl.reciprocal(jnp.sum(p, axis=-1, keepdims=True), approx=True)

    attn_rep = jnp.dot(p, vf, preferred_element_type=jnp.float32) * hmask
    attn_cat = attn_rep[0:ns]                # sublane-aligned row-group sum
    for h in range(1, nhead):
        attn_cat = attn_cat + attn_rep[h * ns:(h + 1) * ns]      # (N*S, E)
    attn = jnp.dot(attn_cat, wsq_ref[3],
                   preferred_element_type=jnp.float32) + vec_ref[3]

    x = _layer_norm(x + attn, vec_ref[5], vec_ref[6])

    # ---- feed-forward (ReLU), dropout = identity ----
    h1 = jnp.dot(x, w1_ref[...], preferred_element_type=jnp.float32) + b1_ref[...]
    h1 = jnp.maximum(h1, 0.0)
    h2 = jnp.dot(h1, w2_ref[...], preferred_element_type=jnp.float32) + vec_ref[4]
    x = _layer_norm(x + h2, vec_ref[7], vec_ref[8])

    xs_ref[...] = x

    # ---- classification head on the last layer ----
    @pl.when(l == pl.num_programs(0) - 1)
    def _():
        pooled = x[(n - 1) * s:, :]          # batch index -1 -> rows (N-1)*S..
        out = jnp.dot(pooled, wc_ref[...],
                      preferred_element_type=jnp.float32) + bc_ref[...]
        out_ref[...] = out.astype(out_ref.dtype)


def init_params(key):
    L, E, F, C = NUM_LAYERS, D_MODEL, DIM_FF, N_CLASSES
    keys = jax.random.split(key, 10)

    def nrm(k, shape, scl=0.1):
        return scl * jax.random.normal(k, shape, jnp.float32)

    return {
        'wqkv': nrm(keys[0], (L, 3 * E, E)),
        'bqkv': nrm(keys[1], (L, 3 * E), 0.02),
        'wo':   nrm(keys[2], (L, E, E)),
        'bo':   nrm(keys[3], (L, E), 0.02),
        'w1':   nrm(keys[4], (L, F, E)),
        'b1':   nrm(keys[5], (L, F), 0.02),
        'w2':   nrm(keys[6], (L, E, F)),
        'b2':   nrm(keys[7], (L, E), 0.02),
        'g1':   jnp.ones((L, E), jnp.float32),
        'be1':  jnp.zeros((L, E), jnp.float32),
        'g2':   jnp.ones((L, E), jnp.float32),
        'be2':  jnp.zeros((L, E), jnp.float32),
        'wc':   nrm(keys[8], (C, E)),
        'bc':   nrm(keys[9], (C,), 0.02),
    }


def _prep_args(src, p):
    """All layout work: transposes, masks, scale folding, lane padding."""
    S, N, E = src.shape
    H = NHEAD
    Dh = E // H
    C = p['wc'].shape[0]
    NS = N * S
    scale = 1.0 / float(Dh) ** 0.5

    x2d = jnp.transpose(src, (1, 0, 2)).reshape(NS, E).astype(jnp.float32)

    wq = p['wqkv'][:, :E, :]
    wk = p['wqkv'][:, E:2 * E, :]
    wv = p['wqkv'][:, 2 * E:, :]
    bq = p['bqkv'][:, :E] * scale            # scale folded into Q path
    bk = p['bqkv'][:, E:2 * E]
    bv = p['bqkv'][:, 2 * E:]

    w_sq = jnp.stack([
        jnp.transpose(wq, (0, 2, 1)) * scale,
        jnp.transpose(wk, (0, 2, 1)),
        jnp.transpose(wv, (0, 2, 1)),
        jnp.transpose(p['wo'], (0, 2, 1)),
    ], axis=1)                                               # (L, 4, E, E)
    w1t = jnp.transpose(p['w1'], (0, 2, 1))                  # (L, E, F)
    w2t = jnp.transpose(p['w2'], (0, 2, 1))                  # (L, F, E)

    vecs = jnp.stack([bq, bk, bv, p['bo'], p['b2'],
                      p['g1'], p['be1'], p['g2'], p['be2']],
                     axis=1)[:, :, None, :]                  # (L, 9, 1, E)
    b1 = p['b1'][:, None, :]                                 # (L, 1, F)

    # per-head / per-batch masks for the packed attention
    row = jnp.arange(H * NS)                 # packed row = h*N*S + n*S + s
    h_of_row = row // NS
    n_of_row = (row % NS) // S
    col_e = jnp.arange(E)
    hmask = (col_e[None, :] // Dh == h_of_row[:, None]).astype(jnp.float32)
    col_k = jnp.arange(NS)
    bmask = jnp.where(col_k[None, :] // S == n_of_row[:, None],
                      0.0, -1e30).astype(jnp.float32)

    # lane-dense classification head (sliced back to C outside the kernel)
    wc_pad = jnp.zeros((E, OUT_LANES), jnp.float32).at[:, :C].set(p['wc'].T)
    bc_pad = jnp.zeros((1, OUT_LANES), jnp.float32).at[0, :C].set(p['bc'])

    return (x2d, hmask, bmask, w_sq, w1t, w2t, vecs, b1, wc_pad, bc_pad)


@jax.jit
def transformer_forward(src, p):
    """src: (S, N, E) float32 (PyTorch batch_first=False layout)."""
    S, N, E = src.shape
    L = p['wqkv'].shape[0]
    F = p['w1'].shape[1]
    C = p['wc'].shape[0]
    NS = N * S
    args = _prep_args(src, p)

    kernel = functools.partial(transformer_kernel, N, S, NHEAD)
    out_pad = pl.pallas_call(
        kernel,
        grid=(L,),
        out_shape=jax.ShapeDtypeStruct((S, OUT_LANES), jnp.float32),
        in_specs=[
            pl.BlockSpec((NS, E), lambda l: (0, 0)),                  # x
            pl.BlockSpec((NHEAD * NS, E), lambda l: (0, 0)),          # head mask
            pl.BlockSpec((NHEAD * NS, NS), lambda l: (0, 0)),         # batch mask
            pl.BlockSpec((None, 4, E, E), lambda l: (l, 0, 0, 0)),    # w_sq
            pl.BlockSpec((None, E, F), lambda l: (l, 0, 0)),          # w1t
            pl.BlockSpec((None, F, E), lambda l: (l, 0, 0)),          # w2t
            pl.BlockSpec((None, 9, 1, E), lambda l: (l, 0, 0, 0)),    # vecs
            pl.BlockSpec((None, 1, F), lambda l: (l, 0, 0)),          # b1
            pl.BlockSpec((E, OUT_LANES), lambda l: (0, 0)),           # wc
            pl.BlockSpec((1, OUT_LANES), lambda l: (0, 0)),           # bc
        ],
        out_specs=pl.BlockSpec((S, OUT_LANES), lambda l: (0, 0)),
        scratch_shapes=[pltpu.VMEM((NS, E), jnp.float32)],
        compiler_params=pltpu.CompilerParams(
            dimension_semantics=("arbitrary",)),
    )(*args)
    return out_pad[:, :C].astype(src.dtype)


def reference_forward(src, p):
    """Pure-JAX reference mirroring PyTorch TransformerEncoder (eval mode)."""
    S, N, E = src.shape
    H, Dh = NHEAD, E // NHEAD
    hp = jax.lax.Precision.HIGHEST
    x = src.astype(jnp.float32)
    L = p['wqkv'].shape[0]
    for l in range(L):
        qkv = jnp.einsum('sne,fe->snf', x, p['wqkv'][l], precision=hp) + p['bqkv'][l]
        q = qkv[..., :E].reshape(S, N, H, Dh)
        k = qkv[..., E:2 * E].reshape(S, N, H, Dh)
        v = qkv[..., 2 * E:].reshape(S, N, H, Dh)
        sc = jnp.einsum('snhd,tnhd->nhst', q, k, precision=hp) / jnp.sqrt(
            jnp.float32(Dh))
        pa = jax.nn.softmax(sc, axis=-1)
        o = jnp.einsum('nhst,tnhd->snhd', pa, v, precision=hp).reshape(S, N, E)
        o = jnp.einsum('sne,fe->snf', o, p['wo'][l], precision=hp) + p['bo'][l]
        x = _layer_norm(x + o, p['g1'][l], p['be1'][l])
        h1 = jax.nn.relu(
            jnp.einsum('sne,fe->snf', x, p['w1'][l], precision=hp) + p['b1'][l])
        h2 = jnp.einsum('snf,ef->sne', h1, p['w2'][l], precision=hp) + p['b2'][l]
        x = _layer_norm(x + h2, p['g2'][l], p['be2'][l])
    pooled = x[:, -1, :]
    return jnp.dot(pooled, p['wc'].T, precision=hp) + p['bc']


if __name__ == "__main__":
    key = jax.random.PRNGKey(0)
    k_src, k_par = jax.random.split(key)
    S, N = 8, 2
    src = jax.random.normal(k_src, (S, N, D_MODEL), jnp.float32)
    params = init_params(k_par)

    out = transformer_forward(src, params)
    out = jax.block_until_ready(out)

    ref = reference_forward(src, params)
    assert out.shape == (S, N_CLASSES), out.shape
    assert bool(jnp.all(jnp.isfinite(out)))
    assert bool(jnp.allclose(out, ref, atol=3e-2, rtol=3e-2)), (out, ref)
    print("KERNEL_OK")
</pallas_src>

<mosaic_0001>
module attributes {stable_mosaic.version = 11 : i64} {
  func.func @transformer_kernel(%arg0: i32, %arg1: memref<16x20xf32, #tpu.memory_space<vmem>>, %arg2: memref<64x20xf32, #tpu.memory_space<vmem>>, %arg3: memref<64x16xf32, #tpu.memory_space<vmem>>, %arg4: memref<1x4x20x20xf32, #tpu.memory_space<vmem>>, %arg5: memref<1x20x128xf32, #tpu.memory_space<vmem>>, %arg6: memref<1x128x20xf32, #tpu.memory_space<vmem>>, %arg7: memref<1x9x1x20xf32, #tpu.memory_space<vmem>>, %arg8: memref<1x1x128xf32, #tpu.memory_space<vmem>>, %arg9: memref<20x128xf32, #tpu.memory_space<vmem>>, %arg10: memref<1x128xf32, #tpu.memory_space<vmem>>, %arg11: memref<8x128xf32, #tpu.memory_space<vmem>>, %arg12: memref<16x20xf32, #tpu.memory_space<vmem>>) attributes {dimension_semantics = [#tpu.dimension_semantics<arbitrary>], iteration_bounds = array<i64: 6>, scalar_prefetch = 0 : i64, scratch_operands = 1 : i64, tpu.core_type = #tpu.core_type<tc>, window_params = [{pipeline_mode = #tpu.pipeline_mode<synchronous>, transform_indices = @transform_0, window_bounds = array<i64: 16, 20>}, {pipeline_mode = #tpu.pipeline_mode<synchronous>, transform_indices = @transform_1, window_bounds = array<i64: 64, 20>}, {pipeline_mode = #tpu.pipeline_mode<synchronous>, transform_indices = @transform_2, window_bounds = array<i64: 64, 16>}, {transform_indices = @transform_3, window_bounds = array<i64: 1, 4, 20, 20>}, {transform_indices = @transform_4, window_bounds = array<i64: 1, 20, 128>}, {transform_indices = @transform_5, window_bounds = array<i64: 1, 128, 20>}, {transform_indices = @transform_6, window_bounds = array<i64: 1, 9, 1, 20>}, {transform_indices = @transform_7, window_bounds = array<i64: 1, 1, 128>}, {pipeline_mode = #tpu.pipeline_mode<synchronous>, transform_indices = @transform_8, window_bounds = array<i64: 20, 128>}, {pipeline_mode = #tpu.pipeline_mode<synchronous>, transform_indices = @transform_9, window_bounds = array<i64: 1, 128>}, {pipeline_mode = #tpu.pipeline_mode<synchronous>, transform_indices = @transform_10, window_bounds = array<i64: 8, 128>}]} {
    %c0_i32 = arith.constant 0 : i32
    %0 = arith.cmpi eq, %arg0, %c0_i32 : i32
    %1 = arith.extui %0 : i1 to i32
    %c0_i32_0 = arith.constant 0 : i32
    %2 = arith.cmpi ne, %1, %c0_i32_0 : i32
    scf.if %2 {
      %c0_82 = arith.constant 0 : index
      %c0_83 = arith.constant 0 : index
      %127 = vector.load %arg1[%c0_82, %c0_83] : memref<16x20xf32, #tpu.memory_space<vmem>>, vector<16x20xf32>
      %c0_84 = arith.constant 0 : index
      %c0_85 = arith.constant 0 : index
      %128 = vector.load %arg12[%c0_84, %c0_85] : memref<16x20xf32, #tpu.memory_space<vmem>>, vector<16x20xf32>
      tpu.vector_store %arg12[%c0_84, %c0_85], %127 {strides = array<i32>} : memref<16x20xf32, #tpu.memory_space<vmem>>, vector<16x20xf32>,
    } else {
    }
    %c0 = arith.constant 0 : index
    %c0_1 = arith.constant 0 : index
    %3 = vector.load %arg12[%c0, %c0_1] : memref<16x20xf32, #tpu.memory_space<vmem>>, vector<16x20xf32>
    %c0_2 = arith.constant 0 : index
    %c0_3 = arith.constant 0 : index
    %4 = vector.load %arg2[%c0_2, %c0_3] : memref<64x20xf32, #tpu.memory_space<vmem>>, vector<64x20xf32>
    %c0_4 = arith.constant 0 : index
    %c0_5 = arith.constant 0 : index
    %c0_6 = arith.constant 0 : index
    %c0_7 = arith.constant 0 : index
    %5 = vector.load %arg4[%c0_4, %c0_5, %c0_6, %c0_7] : memref<1x4x20x20xf32, #tpu.memory_space<vmem>>, vector<1x1x20x20xf32>
    %6 = vector.shape_cast %5 : vector<1x1x20x20xf32> to vector<20x20xf32>
    %cst = arith.constant dense<0.000000e+00> : vector<16x20xf32>
    %7 = tpu.matmul %3, %6, %cst {dimension_numbers = #tpu.dot_dimension_numbers<[1], [0], [0], [1], [0, 0, 1, 1], [], []>} : vector<16x20xf32>, vector<20x20xf32>, vector<16x20xf32> -> vector<16x20xf32>
    %c0_8 = arith.constant 0 : index
    %c0_9 = arith.constant 0 : index
    %c0_10 = arith.constant 0 : index
    %c0_11 = arith.constant 0 : index
    %8 = vector.load %arg7[%c0_8, %c0_9, %c0_10, %c0_11] : memref<1x9x1x20xf32, #tpu.memory_space<vmem>>, vector<1x1x1x20xf32>
    %9 = vector.shape_cast %8 : vector<1x1x1x20xf32> to vector<1x20xf32>
    %10 = vector.broadcast %9 : vector<1x20xf32> to vector<16x20xf32>
    %11 = arith.addf %7, %10 : vector<16x20xf32>
    %c0_12 = arith.constant 0 : index
    %c1 = arith.constant 1 : index
    %c0_13 = arith.constant 0 : index
    %c0_14 = arith.constant 0 : index
    %12 = vector.load %arg4[%c0_12, %c1, %c0_13, %c0_14] : memref<1x4x20x20xf32, #tpu.memory_space<vmem>>, vector<1x1x20x20xf32>
    %13 = vector.shape_cast %12 : vector<1x1x20x20xf32> to vector<20x20xf32>
    %cst_15 = arith.constant dense<0.000000e+00> : vector<16x20xf32>
    %14 = tpu.matmul %3, %13, %cst_15 {dimension_numbers = #tpu.dot_dimension_numbers<[1], [0], [0], [1], [0, 0, 1, 1], [], []>} : vector<16x20xf32>, vector<20x20xf32>, vector<16x20xf32> -> vector<16x20xf32>
    %c0_16 = arith.constant 0 : index
    %c1_17 = arith.constant 1 : index
    %c0_18 = arith.constant 0 : index
    %c0_19 = arith.constant 0 : index
    %15 = vector.load %arg7[%c0_16, %c1_17, %c0_18, %c0_19] : memref<1x9x1x20xf32, #tpu.memory_space<vmem>>, vector<1x1x1x20xf32>
    %16 = vector.shape_cast %15 : vector<1x1x1x20xf32> to vector<1x20xf32>
    %17 = vector.broadcast %16 : vector<1x20xf32> to vector<16x20xf32>
    %18 = arith.addf %14, %17 : vector<16x20xf32>
    %c0_20 = arith.constant 0 : index
    %c2 = arith.constant 2 : index
    %c0_21 = arith.constant 0 : index
    %c0_22 = arith.constant 0 : index
    %19 = vector.load %arg4[%c0_20, %c2, %c0_21, %c0_22] : memref<1x4x20x20xf32, #tpu.memory_space<vmem>>, vector<1x1x20x20xf32>
    %20 = vector.shape_cast %19 : vector<1x1x20x20xf32> to vector<20x20xf32>
    %cst_23 = arith.constant dense<0.000000e+00> : vector<16x20xf32>
    %21 = tpu.matmul %3, %20, %cst_23 {dimension_numbers = #tpu.dot_dimension_numbers<[1], [0], [0], [1], [0, 0, 1, 1], [], []>} : vector<16x20xf32>, vector<20x20xf32>, vector<16x20xf32> -> vector<16x20xf32>
    %c0_24 = arith.constant 0 : index
    %c2_25 = arith.constant 2 : index
    %c0_26 = arith.constant 0 : index
    %c0_27 = arith.constant 0 : index
    %22 = vector.load %arg7[%c0_24, %c2_25, %c0_26, %c0_27] : memref<1x9x1x20xf32, #tpu.memory_space<vmem>>, vector<1x1x1x20xf32>
    %23 = vector.shape_cast %22 : vector<1x1x1x20xf32> to vector<1x20xf32>
    %24 = vector.broadcast %23 : vector<1x20xf32> to vector<16x20xf32>
    %25 = arith.addf %21, %24 : vector<16x20xf32>
    %26 = tpu.concatenate %11, %11, %11, %11 in 0 : vector<16x20xf32>, vector<16x20xf32>, vector<16x20xf32>, vector<16x20xf32> -> vector<64x20xf32>
    %27 = arith.mulf %26, %4 : vector<64x20xf32>
    %cst_28 = arith.constant dense<0.000000e+00> : vector<64x16xf32>
    %28 = tpu.matmul %27, %18, %cst_28 {dimension_numbers = #tpu.dot_dimension_numbers<[1], [1], [0], [0], [0, 0, 1, 0], [], []>} : vector<64x20xf32>, vector<16x20xf32>, vector<64x16xf32> -> vector<64x16xf32>
    %c0_29 = arith.constant 0 : index
    %c0_30 = arith.constant 0 : index
    %29 = vector.load %arg3[%c0_29, %c0_30] : memref<64x16xf32, #tpu.memory_space<vmem>>, vector<64x16xf32>
    %30 = arith.addf %28, %29 : vector<64x16xf32>
    %cst_31 = arith.constant dense<0xFF800000> : vector<64xf32>
    %31 = vector.multi_reduction <maximumf>, %30, %cst_31 [1] : vector<64x16xf32> to vector<64xf32>
    %32 = vector.shape_cast %31 : vector<64xf32> to vector<64x1xf32>
    %33 = vector.broadcast %32 : vector<64x1xf32> to vector<64x16xf32>
    %34 = arith.subf %30, %33 : vector<64x16xf32>
    %35 = math.exp %34 : vector<64x16xf32>
    %cst_32 = arith.constant dense<0.000000e+00> : vector<64xf32>
    %36 = vector.multi_reduction <add>, %35, %cst_32 [1] : vector<64x16xf32> to vector<64xf32>
    %37 = vector.shape_cast %36 : vector<64xf32> to vector<64x1xf32>
    %38 = tpu.reciprocal %37 {approx = true} : vector<64x1xf32> -> vector<64x1xf32>
    %39 = vector.broadcast %38 : vector<64x1xf32> to vector<64x16xf32>
    %40 = arith.mulf %35, %39 : vector<64x16xf32>
    %cst_33 = arith.constant dense<0.000000e+00> : vector<64x20xf32>
    %41 = tpu.matmul %40, %25, %cst_33 {dimension_numbers = #tpu.dot_dimension_numbers<[1], [0], [0], [1], [0, 0, 1, 1], [], []>} : vector<64x16xf32>, vector<16x20xf32>, vector<64x20xf32> -> vector<64x20xf32>
    %42 = arith.mulf %41, %4 : vector<64x20xf32>
    %43 = vector.extract_strided_slice %42 {offsets = [0, 0], sizes = [16, 20], strides = [1, 1]} : vector<64x20xf32> to vector<16x20xf32>
    %44 = vector.extract_strided_slice %42 {offsets = [16, 0], sizes = [16, 20], strides = [1, 1]} : vector<64x20xf32> to vector<16x20xf32>
    %45 = arith.addf %43, %44 : vector<16x20xf32>
    %46 = vector.extract_strided_slice %42 {offsets = [32, 0], sizes = [16, 20], strides = [1, 1]} : vector<64x20xf32> to vector<16x20xf32>
    %47 = arith.addf %45, %46 : vector<16x20xf32>
    %48 = vector.extract_strided_slice %42 {offsets = [48, 0], sizes = [16, 20], strides = [1, 1]} : vector<64x20xf32> to vector<16x20xf32>
    %49 = arith.addf %47, %48 : vector<16x20xf32>
    %c0_34 = arith.constant 0 : index
    %c3 = arith.constant 3 : index
    %c0_35 = arith.constant 0 : index
    %c0_36 = arith.constant 0 : index
    %50 = vector.load %arg4[%c0_34, %c3, %c0_35, %c0_36] : memref<1x4x20x20xf32, #tpu.memory_space<vmem>>, vector<1x1x20x20xf32>
    %51 = vector.shape_cast %50 : vector<1x1x20x20xf32> to vector<20x20xf32>
    %cst_37 = arith.constant dense<0.000000e+00> : vector<16x20xf32>
    %52 = tpu.matmul %49, %51, %cst_37 {dimension_numbers = #tpu.dot_dimension_numbers<[1], [0], [0], [1], [0, 0, 1, 1], [], []>} : vector<16x20xf32>, vector<20x20xf32>, vector<16x20xf32> -> vector<16x20xf32>
    %c0_38 = arith.constant 0 : index
    %c3_39 = arith.constant 3 : index
    %c0_40 = arith.constant 0 : index
    %c0_41 = arith.constant 0 : index
    %53 = vector.load %arg7[%c0_38, %c3_39, %c0_40, %c0_41] : memref<1x9x1x20xf32, #tpu.memory_space<vmem>>, vector<1x1x1x20xf32>
    %54 = vector.shape_cast %53 : vector<1x1x1x20xf32> to vector<1x20xf32>
    %55 = vector.broadcast %54 : vector<1x20xf32> to vector<16x20xf32>
    %56 = arith.addf %52, %55 : vector<16x20xf32>
    %57 = arith.addf %3, %56 : vector<16x20xf32>
    %c0_42 = arith.constant 0 : index
    %c5 = arith.constant 5 : index
    %c0_43 = arith.constant 0 : index
    %c0_44 = arith.constant 0 : index
    %58 = vector.load %arg7[%c0_42, %c5, %c0_43, %c0_44] : memref<1x9x1x20xf32, #tpu.memory_space<vmem>>, vector<1x1x1x20xf32>
    %59 = vector.shape_cast %58 : vector<1x1x1x20xf32> to vector<1x20xf32>
    %c0_45 = arith.constant 0 : index
    %c6 = arith.constant 6 : index
    %c0_46 = arith.constant 0 : index
    %c0_47 = arith.constant 0 : index
    %60 = vector.load %arg7[%c0_45, %c6, %c0_46, %c0_47] : memref<1x9x1x20xf32, #tpu.memory_space<vmem>>, vector<1x1x1x20xf32>
    %61 = vector.shape_cast %60 : vector<1x1x1x20xf32> to vector<1x20xf32>
    %cst_48 = arith.constant dense<0.000000e+00> : vector<16xf32>
    %62 = vector.multi_reduction <add>, %57, %cst_48 [1] : vector<16x20xf32> to vector<16xf32>
    %63 = vector.shape_cast %62 : vector<16xf32> to vector<16x1xf32>
    %cst_49 = arith.constant 2.000000e+01 : f32
    %64 = vector.broadcast %cst_49 : f32 to vector<16x1xf32>
    %65 = arith.divf %63, %64 : vector<16x1xf32>
    %66 = vector.broadcast %65 : vector<16x1xf32> to vector<16x20xf32>
    %67 = arith.subf %57, %66 : vector<16x20xf32>
    %68 = arith.mulf %67, %67 : vector<16x20xf32>
    %cst_50 = arith.constant dense<0.000000e+00> : vector<16xf32>
    %69 = vector.multi_reduction <add>, %68, %cst_50 [1] : vector<16x20xf32> to vector<16xf32>
    %70 = vector.shape_cast %69 : vector<16xf32> to vector<16x1xf32>
    %cst_51 = arith.constant 2.000000e+01 : f32
    %71 = vector.broadcast %cst_51 : f32 to vector<16x1xf32>
    %72 = arith.divf %70, %71 : vector<16x1xf32>
    %cst_52 = arith.constant 9.99999974E-6 : f32
    %73 = vector.broadcast %cst_52 : f32 to vector<16x1xf32>
    %74 = arith.addf %72, %73 : vector<16x1xf32>
    %75 = math.rsqrt %74 : vector<16x1xf32>
    %76 = vector.broadcast %75 : vector<16x1xf32> to vector<16x20xf32>
    %77 = arith.mulf %67, %76 : vector<16x20xf32>
    %78 = vector.broadcast %59 : vector<1x20xf32> to vector<16x20xf32>
    %79 = arith.mulf %77, %78 : vector<16x20xf32>
    %80 = vector.broadcast %61 : vector<1x20xf32> to vector<16x20xf32>
    %81 = arith.addf %79, %80 : vector<16x20xf32>
    %c0_53 = arith.constant 0 : index
    %c0_54 = arith.constant 0 : index
    %c0_55 = arith.constant 0 : index
    %82 = vector.load %arg5[%c0_53, %c0_54, %c0_55] : memref<1x20x128xf32, #tpu.memory_space<vmem>>, vector<1x20x128xf32>
    %83 = vector.shape_cast %82 : vector<1x20x128xf32> to vector<20x128xf32>
    %cst_56 = arith.constant dense<0.000000e+00> : vector<16x128xf32>
    %84 = tpu.matmul %81, %83, %cst_56 {dimension_numbers = #tpu.dot_dimension_numbers<[1], [0], [0], [1], [0, 0, 1, 1], [], []>} : vector<16x20xf32>, vector<20x128xf32>, vector<16x128xf32> -> vector<16x128xf32>
    %c0_57 = arith.constant 0 : index
    %c0_58 = arith.constant 0 : index
    %c0_59 = arith.constant 0 : index
    %85 = vector.load %arg8[%c0_57, %c0_58, %c0_59] : memref<1x1x128xf32, #tpu.memory_space<vmem>>, vector<1x1x128xf32>
    %86 = vector.shape_cast %85 : vector<1x1x128xf32> to vector<1x128xf32>
    %87 = vector.broadcast %86 : vector<1x128xf32> to vector<16x128xf32>
    %88 = arith.addf %84, %87 : vector<16x128xf32>
    %cst_60 = arith.constant 0.000000e+00 : f32
    %89 = vector.broadcast %cst_60 : f32 to vector<16x128xf32>
    %90 = arith.maximumf %88, %89 : vector<16x128xf32>
    %c0_61 = arith.constant 0 : index
    %c0_62 = arith.constant 0 : index
    %c0_63 = arith.constant 0 : index
    %91 = vector.load %arg6[%c0_61, %c0_62, %c0_63] : memref<1x128x20xf32, #tpu.memory_space<vmem>>, vector<1x128x20xf32>
    %92 = vector.shape_cast %91 : vector<1x128x20xf32> to vector<128x20xf32>
    %cst_64 = arith.constant dense<0.000000e+00> : vector<16x20xf32>
    %93 = tpu.matmul %90, %92, %cst_64 {dimension_numbers = #tpu.dot_dimension_numbers<[1], [0], [0], [1], [0, 0, 1, 1], [], []>} : vector<16x128xf32>, vector<128x20xf32>, vector<16x20xf32> -> vector<16x20xf32>
    %c0_65 = arith.constant 0 : index
    %c4 = arith.constant 4 : index
    %c0_66 = arith.constant 0 : index
    %c0_67 = arith.constant 0 : index
    %94 = vector.load %arg7[%c0_65, %c4, %c0_66, %c0_67] : memref<1x9x1x20xf32, #tpu.memory_space<vmem>>, vector<1x1x1x20xf32>
    %95 = vector.shape_cast %94 : vector<1x1x1x20xf32> to vector<1x20xf32>
    %96 = vector.broadcast %95 : vector<1x20xf32> to vector<16x20xf32>
    %97 = arith.addf %93, %96 : vector<16x20xf32>
    %98 = arith.addf %81, %97 : vector<16x20xf32>
    %c0_68 = arith.constant 0 : index
    %c7 = arith.constant 7 : index
    %c0_69 = arith.constant 0 : index
    %c0_70 = arith.constant 0 : index
    %99 = vector.load %arg7[%c0_68, %c7, %c0_69, %c0_70] : memref<1x9x1x20xf32, #tpu.memory_space<vmem>>, vector<1x1x1x20xf32>
    %100 = vector.shape_cast %99 : vector<1x1x1x20xf32> to vector<1x20xf32>
    %c0_71 = arith.constant 0 : index
    %c8 = arith.constant 8 : index
    %c0_72 = arith.constant 0 : index
    %c0_73 = arith.constant 0 : index
    %101 = vector.load %arg7[%c0_71, %c8, %c0_72, %c0_73] : memref<1x9x1x20xf32, #tpu.memory_space<vmem>>, vector<1x1x1x20xf32>
    %102 = vector.shape_cast %101 : vector<1x1x1x20xf32> to vector<1x20xf32>
    %cst_74 = arith.constant dense<0.000000e+00> : vector<16xf32>
    %103 = vector.multi_reduction <add>, %98, %cst_74 [1] : vector<16x20xf32> to vector<16xf32>
    %104 = vector.shape_cast %103 : vector<16xf32> to vector<16x1xf32>
    %cst_75 = arith.constant 2.000000e+01 : f32
    %105 = vector.broadcast %cst_75 : f32 to vector<16x1xf32>
    %106 = arith.divf %104, %105 : vector<16x1xf32>
    %107 = vector.broadcast %106 : vector<16x1xf32> to vector<16x20xf32>
    %108 = arith.subf %98, %107 : vector<16x20xf32>
    %109 = arith.mulf %108, %108 : vector<16x20xf32>
    %cst_76 = arith.constant dense<0.000000e+00> : vector<16xf32>
    %110 = vector.multi_reduction <add>, %109, %cst_76 [1] : vector<16x20xf32> to vector<16xf32>
    %111 = vector.shape_cast %110 : vector<16xf32> to vector<16x1xf32>
    %cst_77 = arith.constant 2.000000e+01 : f32
    %112 = vector.broadcast %cst_77 : f32 to vector<16x1xf32>
    %113 = arith.divf %111, %112 : vector<16x1xf32>
    %cst_78 = arith.constant 9.99999974E-6 : f32
    %114 = vector.broadcast %cst_78 : f32 to vector<16x1xf32>
    %115 = arith.addf %113, %114 : vector<16x1xf32>
    %116 = math.rsqrt %115 : vector<16x1xf32>
    %117 = vector.broadcast %116 : vector<16x1xf32> to vector<16x20xf32>
    %118 = arith.mulf %108, %117 : vector<16x20xf32>
    %119 = vector.broadcast %100 : vector<1x20xf32> to vector<16x20xf32>
    %120 = arith.mulf %118, %119 : vector<16x20xf32>
    %121 = vector.broadcast %102 : vector<1x20xf32> to vector<16x20xf32>
    %122 = arith.addf %120, %121 : vector<16x20xf32>
    %c0_79 = arith.constant 0 : index
    %c0_80 = arith.constant 0 : index
    %123 = vector.load %arg12[%c0_79, %c0_80] : memref<16x20xf32, #tpu.memory_space<vmem>>, vector<16x20xf32>
    tpu.vector_store %arg12[%c0_79, %c0_80], %122 {strides = array<i32>} : memref<16x20xf32, #tpu.memory_space<vmem>>, vector<16x20xf32>,
    %c5_i32 = arith.constant 5 : i32
    %124 = arith.cmpi eq, %arg0, %c5_i32 : i32
    %125 = arith.extui %124 : i1 to i32
    %c0_i32_81 = arith.constant 0 : i32
    %126 = arith.cmpi ne, %125, %c0_i32_81 : i32
    scf.if %126 {
      %127 = vector.extract_strided_slice %122 {offsets = [8, 0], sizes = [8, 20], strides = [1, 1]} : vector<16x20xf32> to vector<8x20xf32>
      %c0_82 = arith.constant 0 : index
      %c0_83 = arith.constant 0 : index
      %128 = vector.load %arg9[%c0_82, %c0_83] : memref<20x128xf32, #tpu.memory_space<vmem>>, vector<20x128xf32>
      %cst_84 = arith.constant dense<0.000000e+00> : vector<8x128xf32>
      %129 = tpu.matmul %127, %128, %cst_84 {dimension_numbers = #tpu.dot_dimension_numbers<[1], [0], [0], [1], [0, 0, 1, 1], [], []>} : vector<8x20xf32>, vector<20x128xf32>, vector<8x128xf32> -> vector<8x128xf32>
      %c0_85 = arith.constant 0 : index
      %c0_86 = arith.constant 0 : index
      %130 = vector.load %arg10[%c0_85, %c0_86] : memref<1x128xf32, #tpu.memory_space<vmem>>, vector<1x128xf32>
      %131 = vector.broadcast %130 : vector<1x128xf32> to vector<8x128xf32>
      %132 = arith.addf %129, %131 : vector<8x128xf32>
      %c0_87 = arith.constant 0 : index
      %c0_88 = arith.constant 0 : index
      %133 = vector.load %arg11[%c0_87, %c0_88] : memref<8x128xf32, #tpu.memory_space<vmem>>, vector<8x128xf32>
      tpu.vector_store %arg11[%c0_87, %c0_88], %132 {strides = array<i32>} : memref<8x128xf32, #tpu.memory_space<vmem>>, vector<8x128xf32>,
    } else {
    }
    return
  }
  func.func @transform_0(%arg0: i32) -> (i32, i32) {
    %c0_i32 = arith.constant 0 : i32
    %c0_i32_0 = arith.constant 0 : i32
    %c0_i32_1 = arith.constant 0 : i32
    return %c0_i32, %c0_i32_0 : i32, i32
  }
  func.func @transform_1(%arg0: i32) -> (i32, i32) {
    %c0_i32 = arith.constant 0 : i32
    %c0_i32_0 = arith.constant 0 : i32
    %c0_i32_1 = arith.constant 0 : i32
    return %c0_i32, %c0_i32_0 : i32, i32
  }
  func.func @transform_2(%arg0: i32) -> (i32, i32) {
    %c0_i32 = arith.constant 0 : i32
    %c0_i32_0 = arith.constant 0 : i32
    %c0_i32_1 = arith.constant 0 : i32
    return %c0_i32, %c0_i32_0 : i32, i32
  }
  func.func @transform_3(%arg0: i32) -> (i32, i32, i32, i32) {
    %c0_i32 = arith.constant 0 : i32
    %c0_i32_0 = arith.constant 0 : i32
    %c0_i32_1 = arith.constant 0 : i32
    %c0_i32_2 = arith.constant 0 : i32
    return %arg0, %c0_i32, %c0_i32_0, %c0_i32_1 : i32, i32, i32, i32
  }
  func.func @transform_4(%arg0: i32) -> (i32, i32, i32) {
    %c0_i32 = arith.constant 0 : i32
    %c0_i32_0 = arith.constant 0 : i32
    %c0_i32_1 = arith.constant 0 : i32
    return %arg0, %c0_i32, %c0_i32_0 : i32, i32, i32
  }
  func.func @transform_5(%arg0: i32) -> (i32, i32, i32) {
    %c0_i32 = arith.constant 0 : i32
    %c0_i32_0 = arith.constant 0 : i32
    %c0_i32_1 = arith.constant 0 : i32
    return %arg0, %c0_i32, %c0_i32_0 : i32, i32, i32
  }
  func.func @transform_6(%arg0: i32) -> (i32, i32, i32, i32) {
    %c0_i32 = arith.constant 0 : i32
    %c0_i32_0 = arith.constant 0 : i32
    %c0_i32_1 = arith.constant 0 : i32
    %c0_i32_2 = arith.constant 0 : i32
    return %arg0, %c0_i32, %c0_i32_0, %c0_i32_1 : i32, i32, i32, i32
  }
  func.func @transform_7(%arg0: i32) -> (i32, i32, i32) {
    %c0_i32 = arith.constant 0 : i32
    %c0_i32_0 = arith.constant 0 : i32
    %c0_i32_1 = arith.constant 0 : i32
    return %arg0, %c0_i32, %c0_i32_0 : i32, i32, i32
  }
  func.func @transform_8(%arg0: i32) -> (i32, i32) {
    %c0_i32 = arith.constant 0 : i32
    %c0_i32_0 = arith.constant 0 : i32
    %c0_i32_1 = arith.constant 0 : i32
    return %c0_i32, %c0_i32_0 : i32, i32
  }
  func.func @transform_9(%arg0: i32) -> (i32, i32) {
    %c0_i32 = arith.constant 0 : i32
    %c0_i32_0 = arith.constant 0 : i32
    %c0_i32_1 = arith.constant 0 : i32
    return %c0_i32, %c0_i32_0 : i32, i32
  }
  func.func @transform_10(%arg0: i32) -> (i32, i32) {
    %c0_i32 = arith.constant 0 : i32
    %c0_i32_0 = arith.constant 0 : i32
    %c0_i32_1 = arith.constant 0 : i32
    return %c0_i32, %c0_i32_0 : i32, i32
  }
}

</mosaic_0001>

<bundles_post_ra>
// kernel: transformer_forward.1
= control target key start
LH: loop header
LB: loop body
LE: loop exit
PB: predicated region body
PF: predicated region fallthrough
CT: control target
= control target key end

     0   :  { %15 = vsyncpa [#allocation4], 0  ;;  %s2087_s13 = smov 0   ;;  %s2379_s0 = inlined_call_operand.vmem [shape: f32[16,20], index: 0, kind: input, shape index: {}]   ;;  %s2380_s1 = inlined_call_operand.vmem [shape: f32[64,20], index: 1, kind: input, shape index: {}]   ;;  %s2381_s2 = inlined_call_operand.vmem [shape: f32[64,16], index: 2, kind: input, shape index: {}]   ;;  %s2382_s3 = inlined_call_operand.vmem [shape: f32[6,4,20,20], index: 3, kind: input, shape index: {}]   ;;  %s2383_s4 = inlined_call_operand.vmem [shape: f32[6,20,128], index: 4, kind: input, shape index: {}]   ;;  %s2384_s5 = inlined_call_operand.vmem [shape: f32[6,128,20], index: 5, kind: input, shape index: {}]   ;;  %s2385_s6 = inlined_call_operand.vmem [shape: f32[6,9,1,20], index: 6, kind: input, shape index: {}]   ;;  %s2386_s7 = inlined_call_operand.vmem [shape: f32[6,1,128], index: 7, kind: input, shape index: {}]   ;;  %s2387_s8 = inlined_call_operand.vmem [shape: f32[20,128], index: 8, kind: input, shape index: {}]   ;;  %s2388_s9 = inlined_call_operand.vmem [shape: f32[1,128], index: 9, kind: input, shape index: {}]   ;;  %s2389_s10 = inlined_call_operand.hbm [shape: f32[8,128], index: 10, kind: output, shape index: {}]  }
   0x1 LB: > { %2391 = sst [smem:[#allocation6_spill]] %s2027_s13  ;;  %s2093_s14 = sadd.s32 4294967295, %s2027_s13   ;;  %s2027_s13 = sphi %s2087_s13, %s21_s13  }
   0x2   : > { %p1670_p0 = scmp.ge.s32.totalorder %s2027_s13, 1  ;;  %p345_p1 = scmp.lt.s32.totalorder %s2027_s13, 7 }
   0x4   : > { %p346_p2 = pnand %p1670_p0, %p345_p1 }
   0x5   : > { %p395_p3 = scmp.lt.s32.totalorder (!%p346_p2), %s2093_s14, 5  ;;  %p1675_p4 = scmp.ne.s32.totalorder (!%p346_p2), %s2093_s14, 0 }
   0x6   : > { %349 = sbr.rel (%p346_p2) target bundleno = 2401 (0x961), region = 60 }
   0xb   : > { %s2099_s15 = scalar_select %p395_p3, %s2093_s14, 5 }
   0xd   : > { %s1933_s16 = smul.u32 96, %s2099_s15  ;;  %s1744_s17 = sshll.u32 %s2099_s15, 7 }
   0xe   : > { %s1934_s18 = smul.u32 24, %s2099_s15  ;;  %s2107_s21 = scalar_lea.vmem %s2384_s5, %s1744_s17 }
   0xf   : > { %s2112_s24 = scalar_lea.vmem %s2382_s3, %s1933_s16  ;;  %s1935_s25 = smul.u32 9, %s2099_s15 }
  0x10   : > { %s2118_s28 = scalar_lea.vmem %s2383_s4, %s1934_s18  ;;  %s416_s11 = scalar_lea.vmem %s2386_s7, %s2099_s15 }
  0x11   : > { %s2127_s17 = scalar_lea.vmem %s2385_s6, %s1935_s25  ;;  %420 = sbr.rel (%p1675_p4) target bundleno = 24 (0x18), region = 64 }
  0x16   : > { %v421_v0 = vld [vmem:[%s2379_s0] sm:$0xff]  ;;  %vm423_vm0 = vcmask 162816   ;;  %v422_v1 = vld [vmem:[%s2379_s0 + $0x8] sm:$0xff] }
  0x17   : > { %424 = vst.msk [vmem:[#allocation2] sm:$0xff] %vm423_vm0, %v421_v0  ;;  %425 = vst.msk [vmem:[#allocation2 + $0x8] sm:$0xff] %vm423_vm0, %v422_v1 }
  0x18 PF: > { %v438_v2 = vld [vmem:[%s2112_s24 + $0x10] sm:$0xf]  ;;  %vm453_vm1 = vcmask 1043456   ;;  %v437_v3 = vld [vmem:[%s2112_s24 + $0x8] sm:$0xff]  ;;  %vm446_vm2 = vcmask 162816   ;;  %v436_v5 = vld [vmem:[%s2112_s24] sm:$0xff] }
  0x19   : > { %1812 = vmatprep.subr.msk.mxu0 %vm453_vm1, %v438_v2  ;;  %v1682_v7 = vld [vmem:[%s2112_s24 + $0x28] sm:$0xf]  ;;  %v1681_v8 = vld [vmem:[%s2112_s24 + $0x20] sm:$0xff]  ;;  %v1680_v9 = vld [vmem:[%s2112_s24 + $0x18] sm:$0xff]  ;;  %vm863_vm3 = vcmask 130048   ;;  %p1736_p5 = scmp.ne.s32.totalorder %s2093_s14, 5 }
  0x1a   : > { %1813 = vmatpush3.msk.msra.mxu0 %vm453_vm1, %v438_v2  ;;  %v1676_v11 = vld [vmem:[%s2127_s17] ss:$0 sm:$0xff]  ;;  %v1684_v15 = vld [vmem:[%s2127_s17 + $0x1] ss:$0 sm:$0xff]  ;;  %v2175_v22 = vld [vmem:[%s2380_s1 + $0x8] sm:$0xff] }
  0x1b   : > { %1814 = vmatprep.subr.mxu0 %v437_v3  ;;  %v2164_v13 = vld [vmem:[%s2380_s1] sm:$0xff]  ;;  %v2180_v23 = vld [vmem:[%s2380_s1 + $0x10] sm:$0xff]  ;;  %v2188_v26 = vld [vmem:[%s2380_s1 + $0x18] sm:$0xff] }
  0x1c   : > { %1815 = vmatpush3.msra.mxu0 %v437_v3  ;;  %v2194_v27 = vld [vmem:[%s2380_s1 + $0x20] sm:$0xff]  ;;  %v2202_v30 = vld [vmem:[%s2380_s1 + $0x28] sm:$0xff]  ;;  %v2208_v31 = vld [vmem:[%s2380_s1 + $0x30] sm:$0xff] }
  0x1d   : > { %1816 = vmatprep.subr.mxu0 %v436_v5  ;;  %v2216_v34 = vld [vmem:[%s2380_s1 + $0x38] sm:$0xff]  ;;  %v1690_v36 = vld [vmem:[%s2112_s24 + $0x40] sm:$0xf]  ;;  %v1688_v38 = vld [vmem:[%s2112_s24 + $0x30] sm:$0xff] }
  0x1e   : > { %v2139_v4 = vld [vmem:[#allocation2] sm:$0xff]  ;;  %v2145_v6 = vld [vmem:[#allocation2 + $0x8] sm:$0xff]  ;;  %1817 = vmatpush3.msra.mxu0 %v436_v5  ;;  %v1689_v37 = vld [vmem:[%s2112_s24 + $0x38] sm:$0xff] }
  0x1f   : > { %1818 = vmatprep.mubr.msk.f32.mxu0 %vm446_vm2, %v2139_v4  ;;  %1821 = vmatprep.subr.msk.mxu0 %vm453_vm1, %v1682_v7  ;;  %v720_v40 = vld [vmem:[%s2381_s2] sm:$0xff]  ;;  %v721_v41 = vld [vmem:[%s2381_s2 + $0x8] sm:$0xff]  ;;  %v722_v45 = vld [vmem:[%s2381_s2 + $0x10] sm:$0xff] }
  0x20   : > { %1819 = vmatmul.mubr.msk.f32.vlgmr.msra.gmra.mxu0 %vm446_vm2, %v2145_v6  ;;  %v723_v48 = vld [vmem:[%s2381_s2 + $0x18] sm:$0xff]  ;;  %v724_v52 = vld [vmem:[%s2381_s2 + $0x20] sm:$0xff]  ;;  %v725_v56 = vld [vmem:[%s2381_s2 + $0x28] sm:$0xff] }
  0x21   : > { %1822 = vmatpush3.msk.msra.mxu0 %vm453_vm1, %v1682_v7  ;;  %1827 = vmatprep.mubr.msk.f32.mxu0 %vm446_vm2, %v2139_v4  ;;  %v726_v60 = vld [vmem:[%s2381_s2 + $0x30] sm:$0xff]  ;;  %v727_v0 = vld [vmem:[%s2381_s2 + $0x38] sm:$0xff] }
  0x22   : > { %1823 = vmatprep.subr.mxu0 %v1681_v8 }
  0x23   : > { %1824 = vmatpush3.msra.mxu0 %v1681_v8 }
  0x24   : > { %1825 = vmatprep.subr.mxu0 %v1680_v9 }
  0x25   : > { %1826 = vmatpush3.msra.mxu0 %v1680_v9 }
  0x26   : > { %1828 = vmatmul.mubr.msk.f32.vlgmr.msra.gmra.mxu0 %vm446_vm2, %v2145_v6  ;;  %1830 = vmatprep.subr.msk.mxu0 %vm453_vm1, %v1690_v36 }
  0x27   : > { %1836 = vmatprep.mubr.msk.f32.mxu0 %vm446_vm2, %v2139_v4  ;;  %1831 = vmatpush3.msk.msra.mxu0 %vm453_vm1, %v1690_v36 }
  0x28   : > { %1832 = vmatprep.subr.mxu0 %v1689_v37 }
  0x29   : > { %1833 = vmatpush3.msra.mxu0 %v1689_v37 }
  0x2a   : > { %1834 = vmatprep.subr.mxu0 %v1688_v38 }
  0x2b   : > { %1835 = vmatpush3.msra.mxu0 %v1688_v38 }
  0x2c   : > { %1837 = vmatmul.mubr.msk.f32.vlgmr.msra.gmra.mxu0 %vm446_vm2, %v2145_v6 }
  0xe0   : > { %v1820_v10 = vpop.f32.mrf.mxu0 }
  0xe1   : > { %v529_v21 = vadd.f32 %v1820_v10, %v1676_v11 }
  0xe2   : > { %v523_v12 = vpop.f32.mrf.mxu0 }
  0xe3   : > { %v524_v14 = vadd.f32 %v1676_v11, %v523_v12  ;;  %v713_v24 = vmul.f32 %v529_v21, %v2175_v22  ;;  %v715_v28 = vmul.f32 %v529_v21, %v2188_v26  ;;  %v717_v32 = vmul.f32 %v529_v21, %v2202_v30 }
  0xe4   : > { %v719_v35 = vmul.f32 %v529_v21, %v2216_v34 }
  0xe5   : > { %v712_v16 = vmul.f32 %v524_v14, %v2164_v13  ;;  %v714_v25 = vmul.f32 %v524_v14, %v2180_v23  ;;  %v716_v29 = vmul.f32 %v524_v14, %v2194_v27  ;;  %v718_v33 = vmul.f32 %v524_v14, %v2208_v31 }
  0xe6   : > { %v1829_v17 = vpop.f32.mrf.mxu0 }
  0xe7   : > { %v619_v18 = vadd.f32 %v1829_v17, %v1684_v15  ;;  %1843 = vmatprep.mubr.msk.f32.mxu1 %vm446_vm2, %v712_v16 }
  0xe8   : > { %v613_v19 = vpop.f32.mrf.mxu0 }
  0xe9   : > { %v614_v20 = vadd.f32 %v1684_v15, %v613_v19  ;;  %1839 = vmatprep.subr.msk.mxu1 %vm446_vm2, %v619_v18 }
  0xea   : > { %1840 = vmatpush3.xpose.msk.msra.mxu1 %vm446_vm2, %v619_v18 }
  0xeb   : > { %1841 = vmatprep.subr.msk.mxu1 %vm446_vm2, %v614_v20 }
  0xee   : > { %1842 = vmatpush3.xpose.msk.msra.mxu1 %vm446_vm2, %v614_v20 }
  0xf1   : > { %1844 = vmatmul.mubr.msk.f32.vlgmr.msra.gmra.mxu1 %vm446_vm2, %v713_v24 }
  0xf2   : > { %1846 = vmatprep.mubr.msk.f32.mxu1 %vm446_vm2, %v714_v25 }
  0xf5   : > { %1847 = vmatmul.mubr.msk.f32.gmra.mxu1 %vm446_vm2, %v715_v28 }
  0xf6   : > { %1849 = vmatprep.mubr.msk.f32.mxu1 %vm446_vm2, %v716_v29 }
  0xf9   : > { %1850 = vmatmul.mubr.msk.f32.gmra.mxu1 %vm446_vm2, %v717_v32 }
  0xfa   : > { %1852 = vmatprep.mubr.msk.f32.mxu1 %vm446_vm2, %v718_v33 }
  0xfd   : > { %1853 = vmatmul.mubr.msk.f32.gmra.mxu1 %vm446_vm2, %v719_v35 }
 0x1b1   : > { %v1845_v39 = vpop.f32.mrf.mxu1 }
 0x1b2   : > { %v830_v46 = vadd.f32 %v1845_v39, %v721_v41 }
 0x1b3   : > { %v824_v42 = vpop.f32.mrf.mxu1 }
 0x1b4   : > { %v825_v43 = vadd.f32 %v824_v42, %v720_v40  ;;  %v867_v55 = vsel %vm863_vm3, %v830_v46, -inf }
 0x1b5   : > { %v1848_v44 = vpop.f32.mrf.mxu1 }
 0x1b6   : > { %v864_v47 = vsel %vm863_vm3, %v825_v43, -inf  ;;  %v840_v53 = vadd.f32 %v1848_v44, %v723_v48 }
 0x1b7   : > { %v834_v49 = vpop.f32.mrf.mxu1  ;;  %865 = vmax.xlane.f32.xlu0 %v864_v47 }
 0x1b8   : > { %v835_v50 = vadd.f32 %v834_v49, %v722_v45  ;;  %v873_v62 = vsel %vm863_vm3, %v840_v53, -inf }
 0x1b9   : > { %v1851_v51 = vpop.f32.mrf.mxu1 }
 0x1ba   : > { %v870_v54 = vsel %vm863_vm3, %v835_v50, -inf  ;;  %v850_v61 = vadd.f32 %v1851_v51, %v725_v56 }
 0x1bb   : > { %v844_v57 = vpop.f32.mrf.mxu1  ;;  %871 = vmax.xlane.f32.xlu1 %v870_v54  ;;  %868 = vmax.xlane.f32.xlu0 %v867_v55 }
 0x1bc   : > { %v845_v58 = vadd.f32 %v844_v57, %v724_v52  ;;  %v879_v5 = vsel %vm863_vm3, %v850_v61, -inf  ;;  %v1838_v57 = vpop.f32.mrf.mxu0 }
 0x1bd   : > { %v1854_v59 = vpop.f32.mrf.mxu1 }
 0x1be   : > { %v876_v63 = vsel %vm863_vm3, %v845_v58, -inf  ;;  %v860_v3 = vadd.f32 %v1854_v59, %v727_v0 }
 0x1bf   : > { %v854_v1 = vpop.f32.mrf.mxu1  ;;  %874 = vmax.xlane.f32.xlu1 %v873_v62  ;;  %877 = vmax.xlane.f32.xlu0 %v876_v63 }
 0x1c0   : > { %v855_v2 = vadd.f32 %v854_v1, %v726_v60  ;;  %v885_v8 = vsel %vm863_vm3, %v860_v3, -inf  ;;  %v703_v60 = vpop.f32.mrf.mxu0 }
 0x1c2   : > { %v882_v7 = vsel %vm863_vm3, %v855_v2, -inf }
 0x1c3   : > { %880 = vmax.xlane.f32.xlu1 %v879_v5  ;;  %883 = vmax.xlane.f32.xlu0 %v882_v7 }
 0x1c7   : > { %886 = vmax.xlane.f32.xlu1 %v885_v8 }
 0x240   : > { %v866_v9 = vpop.xlane.xlu0 %865 }
 0x241   : > { %v888_v10 = vsub.f32 %v825_v43, %v866_v9 }
 0x243   : > { %v896_v11 = vmul.f32 1.442695, %v888_v10 }
 0x244   : > { %v872_v12 = vpop.xlane.xlu1 %871  ;;  %v869_v14 = vpop.xlane.xlu0 %868 }
 0x245   : > { %1953 = vpow2.f32 %v896_v11  ;;  %v890_v15 = vsub.f32 %v835_v50, %v872_v12  ;;  %v889_v16 = vsub.f32 %v830_v46, %v869_v14 }
 0x247   : > { %v900_v17 = vmul.f32 1.442695, %v890_v15  ;;  %v898_v18 = vmul.f32 1.442695, %v889_v16 }
 0x248   : > { %v875_v19 = vpop.xlane.xlu1 %874  ;;  %v878_v20 = vpop.xlane.xlu0 %877 }
 0x249   : > { %1955 = vpow2.f32 %v900_v17  ;;  %v891_v21 = vsub.f32 %v840_v53, %v875_v19  ;;  %v892_v24 = vsub.f32 %v845_v58, %v878_v20  ;;  %v1692_v58 = vld [vmem:[%s2127_s17 + $0x2] ss:$0 sm:$0xff] }
 0x24a   : > { %1957 = vpow2.f32 %v898_v18  ;;  %v709_v59 = vadd.f32 %v1838_v57, %v1692_v58 }
 0x24b   : > { %v902_v25 = vmul.f32 1.442695, %v891_v21  ;;  %v904_v28 = vmul.f32 1.442695, %v892_v24 }
 0x24c   : > { %v881_v29 = vpop.xlane.xlu1 %880  ;;  %v884_v32 = vpop.xlane.xlu0 %883  ;;  %1855 = vmatprep.subr.mxu0 %v709_v59 }
 0x24d   : > { %1959 = vpow2.f32 %v902_v25  ;;  %v893_v33 = vsub.f32 %v850_v61, %v881_v29  ;;  %v894_v35 = vsub.f32 %v855_v2, %v884_v32  ;;  %v704_v61 = vadd.f32 %v1692_v58, %v703_v60  ;;  %1856 = vmatpush3.msra.mxu0 %v709_v59  ;;  %v1716_v29 = vld [vmem:[%s2112_s24 + $0x58] sm:$0xf]  ;;  %v1715_v32 = vld [vmem:[%s2112_s24 + $0x50] sm:$0xff] }
 0x24e   : > { %1961 = vpow2.f32 %v904_v28 }
 0x24f   : > { %v906_v36 = vmul.f32 1.442695, %v893_v33  ;;  %v908_v37 = vmul.f32 1.442695, %v894_v35  ;;  %1857 = vmatprep.subr.mxu0 %v704_v61  ;;  %v1714_v33 = vld [vmem:[%s2112_s24 + $0x48] sm:$0xff] }
 0x250   : > { %v887_v38 = vpop.xlane.xlu1 %886  ;;  %1858 = vmatpush3.msra.mxu0 %v704_v61 }
 0x251   : > { %1963 = vpow2.f32 %v906_v36  ;;  %v895_v39 = vsub.f32 %v860_v3, %v887_v38  ;;  %1871 = vmatprep.subr.msk.mxu0 %vm453_vm1, %v1716_v29 }
 0x252   : > { %v1954_v40 = vpop.eup %1953  ;;  %1965 = vpow2.f32 %v908_v37 }
 0x253   : > { %v910_v41 = vmul.f32 1.442695, %v895_v39  ;;  %v912_v42 = vsel %vm863_vm3, %v1954_v40, 0.0 }
 0x254   : > { %913 = vadd.xlane.f32.xlu0 %v912_v42 }
 0x255   : > { %1967 = vpow2.f32 %v910_v41 }
 0x256   : > { %v1956_v43 = vpop.eup %1955 }
 0x257   : > { %v1958_v44 = vpop.eup %1957  ;;  %v918_v45 = vsel %vm863_vm3, %v1956_v43, 0.0 }
 0x258   : > { %919 = vadd.xlane.f32.xlu0 %v918_v45  ;;  %v915_v46 = vsel %vm863_vm3, %v1958_v44, 0.0 }
 0x259   : > { %916 = vadd.xlane.f32.xlu1 %v915_v46 }
 0x25a   : > { %v1960_v47 = vpop.eup %1959 }
 0x25b   : > { %v1962_v48 = vpop.eup %1961  ;;  %v921_v49 = vsel %vm863_vm3, %v1960_v47, 0.0 }
 0x25c   : > { %v924_v50 = vsel %vm863_vm3, %v1962_v48, 0.0 }
 0x25d   : > { %922 = vadd.xlane.f32.xlu1 %v921_v49  ;;  %925 = vadd.xlane.f32.xlu0 %v924_v50 }
 0x25e   : > { %v1964_v51 = vpop.eup %1963 }
 0x25f   : > { %v1966_v52 = vpop.eup %1965  ;;  %v927_v53 = vsel %vm863_vm3, %v1964_v51, 0.0 }
 0x260   : > { %v930_v54 = vsel %vm863_vm3, %v1966_v52, 0.0 }
 0x261   : > { %928 = vadd.xlane.f32.xlu1 %v927_v53  ;;  %931 = vadd.xlane.f32.xlu0 %v930_v54 }
 0x262   : > { %v1968_v55 = vpop.eup %1967 }
 0x263   : > { %v933_v56 = vsel %vm863_vm3, %v1968_v55, 0.0 }
 0x265   : > { %934 = vadd.xlane.f32.xlu1 %v933_v56 }
 0x2dd   : > { %v914_v62 = vpop.xlane.xlu0 %913 }
 0x2de   : > { %1969 = vrcp.f32 %v914_v62 }
 0x2e1   : > { %v920_v63 = vpop.xlane.xlu0 %919 }
 0x2e2   : > { %v917_v0 = vpop.xlane.xlu1 %916  ;;  %1971 = vrcp.f32 %v920_v63 }
 0x2e3   : > { %1973 = vrcp.f32 %v917_v0 }
 0x2e6   : > { %v923_v1 = vpop.xlane.xlu1 %922  ;;  %v926_v2 = vpop.xlane.xlu0 %925 }
 0x2e7   : > { %1975 = vrcp.f32 %v923_v1 }
 0x2e8   : > { %1977 = vrcp.f32 %v926_v2  ;;  %v1242_v2 = vld [vmem:[%s2118_s28 + $0x10] sm:$0xf] }
 0x2ea   : > { %v929_v3 = vpop.xlane.xlu1 %928  ;;  %v932_v5 = vpop.xlane.xlu0 %931 }
 0x2eb   : > { %v1970_v7 = vpop.eup %1969  ;;  %1979 = vrcp.f32 %v929_v3  ;;  %v1241_v3 = vld [vmem:[%s2118_s28 + $0x8] sm:$0xff] }
 0x2ec   : > { %1981 = vrcp.f32 %v932_v5  ;;  %v944_v8 = vmul.f32 %v1970_v7, %v1954_v40  ;;  %v1240_v5 = vld [vmem:[%s2118_s28] sm:$0xff]  ;;  %v1351_v7 = vld [vmem:[%s2107_s21 + $0x78] sm:$0xff] }
 0x2ed   : > { %1889 = vmatprep.subr.mxu1 %v1351_v7 }
 0x2ee   : > { %v935_v9 = vpop.xlane.xlu1 %934  ;;  %1859 = vmatprep.mubr.msk.f32.mxu0 %vm863_vm3, %v944_v8  ;;  %v1350_v8 = vld [vmem:[%s2107_s21 + $0x70] sm:$0xff]  ;;  %1890 = vmatpush3.msra.mxu1 %v1351_v7 }
 0x2ef   : > { %v1972_v10 = vpop.eup %1971  ;;  %1983 = vrcp.f32 %v935_v9  ;;  %v1349_v9 = vld [vmem:[%s2107_s21 + $0x68] sm:$0xff]  ;;  %1891 = vmatprep.subr.mxu1 %v1350_v8 }
 0x2f0   : > { %v1974_v11 = vpop.eup %1973  ;;  %v946_v12 = vmul.f32 %v1972_v10, %v1956_v43  ;;  %1892 = vmatpush3.msra.mxu1 %v1350_v8  ;;  %v1348_v10 = vld [vmem:[%s2107_s21 + $0x60] sm:$0xff] }
 0x2f1   : > { %v945_v14 = vmul.f32 %v1974_v11, %v1958_v44  ;;  %1893 = vmatprep.subr.mxu1 %v1349_v9  ;;  %v1347_v11 = vld [vmem:[%s2107_s21 + $0x58] sm:$0xff]  ;;  %v1734_v8 = vld [vmem:[%s2127_s17 + $0x7] ss:$0 sm:$0xff] }
 0x2f2   : > { %1894 = vmatpush3.msra.mxu1 %v1349_v9 }
 0x2f3   : > { %1860 = vmatmul.mubr.msk.f32.vlgmr.msra.gmra.mxu0 %vm863_vm3, %v945_v14  ;;  %1895 = vmatprep.subr.mxu1 %v1348_v10  ;;  %v1345_v14 = vld [vmem:[%s2107_s21 + $0x48] sm:$0xff] }
 0x2f4   : > { %v1976_v15 = vpop.eup %1975  ;;  %1862 = vmatprep.mubr.msk.f32.mxu0 %vm863_vm3, %v946_v12  ;;  %1872 = vmatpush3.msk.msra.mxu0 %vm453_vm1, %v1716_v29  ;;  %v1346_v12 = vld [vmem:[%s2107_s21 + $0x50] sm:$0xff] }
 0x2f5   : > { %v1978_v16 = vpop.eup %1977  ;;  %v947_v17 = vmul.f32 %v1976_v15, %v1960_v47  ;;  %1873 = vmatprep.subr.mxu0 %v1715_v32  ;;  %1896 = vmatpush3.msra.mxu1 %v1348_v10  ;;  %v1344_v15 = vld [vmem:[%s2107_s21 + $0x40] sm:$0xff] }
 0x2f6   : > { %v948_v18 = vmul.f32 %v1978_v16, %v1962_v48  ;;  %1874 = vmatpush3.msra.mxu0 %v1715_v32  ;;  %1897 = vmatprep.subr.mxu1 %v1347_v11  ;;  %v1343_v16 = vld [vmem:[%s2107_s21 + $0x38] sm:$0xff] }
 0x2f7   : > { %1863 = vmatmul.mubr.msk.f32.gmra.mxu0 %vm863_vm3, %v947_v17  ;;  %1875 = vmatprep.subr.mxu0 %v1714_v33  ;;  %v1342_v17 = vld [vmem:[%s2107_s21 + $0x30] sm:$0xff] }
 0x2f8   : > { %v1980_v19 = vpop.eup %1979  ;;  %1865 = vmatprep.mubr.msk.f32.mxu0 %vm863_vm3, %v948_v18  ;;  %1876 = vmatpush3.msra.mxu0 %v1714_v33  ;;  %v1341_v18 = vld [vmem:[%s2107_s21 + $0x28] sm:$0xff]  ;;  %v1724_v33 = vld [vmem:[%s2127_s17 + $0x5] ss:$0 sm:$0xff] }
 0x2f9   : > { %v1982_v20 = vpop.eup %1981  ;;  %v949_v21 = vmul.f32 %v1980_v19, %v1964_v51  ;;  %1880 = vmatprep.subr.msk.mxu0 %vm453_vm1, %v1242_v2  ;;  %1898 = vmatpush3.msra.mxu1 %v1347_v11  ;;  %v1340_v19 = vld [vmem:[%s2107_s21 + $0x20] sm:$0xff]  ;;  %v1735_v11 = vld [vmem:[%s2127_s17 + $0x8] ss:$0 sm:$0xff] }
 0x2fa   : > { %v950_v24 = vmul.f32 %v1982_v20, %v1966_v52  ;;  %1899 = vmatprep.subr.mxu1 %v1346_v12 }
 0x2fb   : > { %1866 = vmatmul.mubr.msk.f32.gmra.mxu0 %vm863_vm3, %v949_v21  ;;  %1900 = vmatpush3.msra.mxu1 %v1346_v12 }
 0x2fc   : > { %v1984_v25 = vpop.eup %1983  ;;  %1868 = vmatprep.mubr.msk.f32.mxu0 %vm863_vm3, %v950_v24  ;;  %1901 = vmatprep.subr.mxu1 %v1345_v14 }
 0x2fd   : > { %v951_v28 = vmul.f32 %v1984_v25, %v1968_v55  ;;  %1902 = vmatpush3.msra.mxu1 %v1345_v14 }
 0x2fe   : > { %1903 = vmatprep.subr.mxu1 %v1344_v15 }
 0x2ff   : > { %1869 = vmatmul.mubr.msk.f32.gmra.mxu0 %vm863_vm3, %v951_v28  ;;  %1904 = vmatpush3.msra.mxu1 %v1344_v15 }
 0x300   : > { %1905 = vmatprep.subr.mxu1 %v1343_v16 }
 0x301   : > { %1906 = vmatpush3.msra.mxu1 %v1343_v16 }
 0x302   : > { %1907 = vmatprep.subr.mxu1 %v1342_v17 }
 0x303   : > { %1908 = vmatpush3.msra.mxu1 %v1342_v17 }
 0x304   : > { %1909 = vmatprep.subr.mxu1 %v1341_v18 }
 0x305   : > { %1910 = vmatpush3.msra.mxu1 %v1341_v18 }
 0x306   : > { %1911 = vmatprep.subr.mxu1 %v1340_v19 }
 0x307   : > { %1912 = vmatpush3.msra.mxu1 %v1340_v19 }
 0x3b3   : > { %v1861_v35 = vpop.f32.mrf.mxu0 }
 0x3b4   : > { %v1082_v45 = vmul.f32 %v1861_v35, %v2175_v22 }
 0x3b5   : > { %v1042_v36 = vpop.f32.mrf.mxu0 }
 0x3b6   : > { %v1081_v43 = vmul.f32 %v1042_v36, %v2164_v13  ;;  %v1718_v13 = vld [vmem:[%s2127_s17 + $0x3] ss:$0 sm:$0xff] }
 0x3b7   : > { %v1864_v37 = vpop.f32.mrf.mxu0 }
 0x3b8   : > { %v1084_v41 = vmul.f32 %v1864_v37, %v2188_v26 }
 0x3b9   : > { %v1052_v38 = vpop.f32.mrf.mxu0 }
 0x3ba   : > { %v1083_v40 = vmul.f32 %v1052_v38, %v2180_v23  ;;  %v1090_v49 = vadd.f32 %v1084_v41, %v1082_v45  ;;  %v1337_v45 = vld [vmem:[%s2107_s21 + $0x8] sm:$0xff] }
 0x3bb   : > { %v1867_v39 = vpop.f32.mrf.mxu0 }
 0x3bc   : > { %v1086_v46 = vmul.f32 %v1867_v39, %v2202_v30  ;;  %v1089_v48 = vadd.f32 %v1083_v40, %v1081_v43  ;;  %v1725_v39 = vld [vmem:[%s2127_s17 + $0x6] ss:$0 sm:$0xff]  ;;  %v1339_v43 = vld [vmem:[%s2107_s21 + $0x18] sm:$0xff] }
 0x3bd   : > { %v1062_v42 = vpop.f32.mrf.mxu0  ;;  %1913 = vmatprep.subr.mxu1 %v1339_v43 }
 0x3be   : > { %v1085_v44 = vmul.f32 %v1062_v42, %v2194_v27  ;;  %v1092_v26 = vadd.f32 %v1090_v49, %v1086_v46  ;;  %1914 = vmatpush3.msra.mxu1 %v1339_v43  ;;  %v1336_v46 = vld [vmem:[%s2107_s21] sm:$0xff] }
 0x3bf   : > { %v1870_v47 = vpop.f32.mrf.mxu0 }
 0x3c0   : > { %v1088_v50 = vmul.f32 %v1870_v47, %v2216_v34  ;;  %v1091_v52 = vadd.f32 %v1089_v48, %v1085_v44  ;;  %v1338_v44 = vld [vmem:[%s2107_s21 + $0x10] sm:$0xff]  ;;  %v1726_v47 = vld [vmem:[%s416_s11] ss:$0 sm:$0xff] }
 0x3c1   : > { %v1072_v51 = vpop.f32.mrf.mxu0  ;;  %1915 = vmatprep.subr.mxu1 %v1338_v44 }
 0x3c2   : > { %v1087_v23 = vmul.f32 %v1072_v51, %v2208_v31  ;;  %v1094_v54 = vadd.f32 %v1092_v26, %v1088_v50  ;;  %1916 = vmatpush3.msra.mxu1 %v1338_v44  ;;  %v1731_v26 = vld [vmem:[%s2127_s17 + $0x4] ss:$0 sm:$0xff] }
 0x3c3   : > { %1917 = vmatprep.subr.mxu1 %v1337_v45 }
 0x3c4   : > { %v1093_v53 = vadd.f32 %v1091_v52, %v1087_v23  ;;  %1918 = vmatpush3.msra.mxu1 %v1337_v45 }
 0x3c5   : > { %1919 = vmatprep.subr.mxu1 %v1336_v46 }
 0x3c6   : > { %1877 = vmatprep.mubr.msk.f32.mxu0 %vm446_vm2, %v1093_v53  ;;  %1920 = vmatpush3.msra.mxu1 %v1336_v46 }
 0x3c7   : > { %1878 = vmatmul.mubr.msk.f32.vlgmr.msra.gmra.mxu0 %vm446_vm2, %v1094_v54 }
 0x3c8   : > { %1881 = vmatpush3.msk.msra.mxu0 %vm453_vm1, %v1242_v2 }
 0x3c9   : > { %1882 = vmatprep.subr.mxu0 %v1241_v3 }
 0x3ca   : > { %1883 = vmatpush3.msra.mxu0 %v1241_v3 }
 0x3cb   : > { %1884 = vmatprep.subr.mxu0 %v1240_v5 }
 0x3cc   : > { %1885 = vmatpush3.msra.mxu0 %v1240_v5 }
 0x487   : > { %v1879_v22 = vpop.f32.mrf.mxu0 }
 0x488   : > { %v1188_v27 = vadd.f32 %v1879_v22, %v1718_v13 }
 0x489   : > { %v1182_v30 = vpop.f32.mrf.mxu0 }
 0x48a   : > { %v1183_v55 = vadd.f32 %v1718_v13, %v1182_v30  ;;  %v1192_v56 = vadd.f32 %v1188_v27, %v2145_v6 }
 0x48c   : > { %v1200_v34 = vsel %vm446_vm2, %v1192_v56, 0.0  ;;  %v1191_v57 = vadd.f32 %v1183_v55, %v2139_v4 }
 0x48d   : > { %1201 = vadd.xlane.f32.xlu1 %v1200_v34 }
 0x48e   : > { %v1197_v31 = vsel %vm446_vm2, %v1191_v57, 0.0 }
 0x48f   : > { %1198 = vadd.xlane.f32.xlu0 %v1197_v31 }
 0x516   : > { %v1202_v58 = vpop.xlane.xlu1 %1201 }
 0x517   : > { %v1205_v59 = vmul.f32 0.05, %v1202_v58 }
 0x518   : > { %v1199_v60 = vpop.xlane.xlu0 %1198 }
 0x519   : > { %v2298_v61 = vsub.f32 %v1192_v56, %v1205_v59  ;;  %v1204_v62 = vmul.f32 0.05, %v1199_v60 }
 0x51b   : > { %v2300_v63 = vsub.f32 %v1191_v57, %v1204_v62  ;;  %v1209_v6 = vmul.f32 %v2298_v61, %v2298_v61 }
 0x51d   : > { %v1213_v4 = vsel %vm446_vm2, %v1209_v6, 0.0  ;;  %v1208_v0 = vmul.f32 %v2300_v63, %v2300_v63 }
 0x51e   : > { %1214 = vadd.xlane.f32.xlu1 %v1213_v4 }
 0x51f   : > { %v1210_v1 = vsel %vm446_vm2, %v1208_v0, 0.0 }
 0x520   : > { %1211 = vadd.xlane.f32.xlu0 %v1210_v1 }
 0x5a7   : > { %v1215_v20 = vpop.xlane.xlu1 %1214 }
 0x5a8   : > { %v1217_v21 = vmul.f32 0.05, %v1215_v20 }
 0x5a9   : > { %v1212_v24 = vpop.xlane.xlu0 %1211 }
 0x5aa   : > { %v1219_v25 = vadd.f32 1e-05, %v1217_v21  ;;  %v1216_v28 = vmul.f32 0.05, %v1212_v24 }
 0x5ac   : > { %1985 = vrsqrt.f32 %v1219_v25  ;;  %v1218_v29 = vadd.f32 1e-05, %v1216_v28 }
 0x5ae   : > { %1987 = vrsqrt.f32 %v1218_v29 }
 0x5b9   : > { %v1986_v32 = vpop.eup %1985 }
 0x5ba   : > { %v1223_v35 = vmul.f32 %v1986_v32, %v2298_v61 }
 0x5bb   : > { %v1988_v36 = vpop.eup %1987 }
 0x5bc   : > { %v1222_v37 = vmul.f32 %v1988_v36, %v2300_v63  ;;  %v1231_v38 = vmul.f32 %v1724_v33, %v1223_v35 }
 0x5be   : > { %v1230_v40 = vmul.f32 %v1724_v33, %v1222_v37  ;;  %v1239_v42 = vadd.f32 %v1725_v39, %v1231_v38 }
 0x5c0   : > { %v1238_v41 = vadd.f32 %v1725_v39, %v1230_v40 }
 0x5c2   : > { %1886 = vmatprep.mubr.msk.f32.mxu0 %vm446_vm2, %v1238_v41 }
 0x5c3   : > { %1887 = vmatmul.mubr.msk.f32.vlgmr.msra.gmra.mxu0 %vm446_vm2, %v1239_v42 }
 0x683   : > { %v1888_v48 = vpop.f32.mrf.mxu0 }
 0x684   : > { %v1331_v49 = vadd.f32 %v1888_v48, %v1726_v47 }
 0x685   : > { %v1325_v50 = vpop.f32.mrf.mxu0 }
 0x686   : > { %v1326_v51 = vadd.f32 %v1726_v47, %v1325_v50  ;;  %v1335_v23 = vmax.f32 %v1331_v49, 0.0 }
 0x688   : > { %v1334_v52 = vmax.f32 %v1326_v51, 0.0 }
 0x68a   : > { %1921 = vmatprep.mubr.f32.mxu1 %v1334_v52 }
 0x68b   : > { %1922 = vmatmul.mubr.f32.vlgmr.msra.gmra.mxu1 %v1335_v23 }
 0x74b   : > { %v1923_v53 = vpop.f32.mrf.mxu1 }
 0x74c   : > { %v1432_v54 = vadd.f32 %v1923_v53, %v1731_v26 }
 0x74d   : > { %v1426_v13 = vpop.f32.mrf.mxu1 }
 0x74e   : > { %v1427_v22 = vadd.f32 %v1731_v26, %v1426_v13  ;;  %v1436_v27 = vadd.f32 %v1432_v54, %v1239_v42 }
 0x750   : > { %v1444_v30 = vsel %vm446_vm2, %v1436_v27, 0.0  ;;  %v1435_v55 = vadd.f32 %v1427_v22, %v1238_v41 }
 0x751   : > { %1445 = vadd.xlane.f32.xlu1 %v1444_v30 }
 0x752   : > { %v1441_v56 = vsel %vm446_vm2, %v1435_v55, 0.0 }
 0x753   : > { %1442 = vadd.xlane.f32.xlu0 %v1441_v56 }
 0x7da   : > { %v1446_v34 = vpop.xlane.xlu1 %1445 }
 0x7db   : > { %v1448_v57 = vmul.f32 0.05, %v1446_v34 }
 0x7dc   : > { %v1443_v31 = vpop.xlane.xlu0 %1442 }
 0x7dd   : > { %v1450_v58 = vsub.f32 %v1436_v27, %v1448_v57  ;;  %v1447_v59 = vmul.f32 0.05, %v1443_v31 }
 0x7df   : > { %v1449_v60 = vsub.f32 %v1435_v55, %v1447_v59  ;;  %v1452_v61 = vmul.f32 %v1450_v58, %v1450_v58 }
 0x7e1   : > { %v1456_v62 = vsel %vm446_vm2, %v1452_v61, 0.0  ;;  %v1451_v63 = vmul.f32 %v1449_v60, %v1449_v60 }
 0x7e2   : > { %1457 = vadd.xlane.f32.xlu1 %v1456_v62 }
 0x7e3   : > { %v1453_v6 = vsel %vm446_vm2, %v1451_v63, 0.0 }
 0x7e4   : > { %1454 = vadd.xlane.f32.xlu0 %v1453_v6 }
 0x86b   : > { %v1458_v4 = vpop.xlane.xlu1 %1457 }
 0x86c   : > { %v1460_v0 = vmul.f32 0.05, %v1458_v4 }
 0x86d   : > { %v1455_v1 = vpop.xlane.xlu0 %1454 }
 0x86e   : > { %v1462_v2 = vadd.f32 1e-05, %v1460_v0  ;;  %v1459_v3 = vmul.f32 0.05, %v1455_v1 }
 0x870   : > { %1989 = vrsqrt.f32 %v1462_v2  ;;  %v1461_v5 = vadd.f32 1e-05, %v1459_v3 }
 0x872   : > { %1991 = vrsqrt.f32 %v1461_v5 }
 0x87d   : > { %v1990_v7 = vpop.eup %1989 }
 0x87e   : > { %v1466_v9 = vmul.f32 %v1990_v7, %v1450_v58 }
 0x87f   : > { %v1992_v10 = vpop.eup %1991 }
 0x880   : > { %v1474_v12 = vmul.f32 %v1734_v8, %v1466_v9  ;;  %v1465_v14 = vmul.f32 %v1992_v10, %v1449_v60 }
 0x882   : > { %v1482_v15 = vadd.f32 %v1735_v11, %v1474_v12  ;;  %v1473_v16 = vmul.f32 %v1734_v8, %v1465_v14  ;;  %1488 = sbr.rel (%p1736_p5) target bundleno = 2386 (0x952), region = 68 }
 0x884   : > { %1484 = vst.msk [vmem:[#allocation2 + $0x8] sm:$0xff] %vm446_vm2, %v1482_v15  ;;  %v1481_v17 = vadd.f32 %v1735_v11, %v1473_v16 }
 0x886   : > { %1483 = vst.msk [vmem:[#allocation2] sm:$0xff] %vm446_vm2, %v1481_v17 }
 0x887   : > { %v1491_v18 = vld [vmem:[%s2387_s8 + $0x10] sm:$0xf]  ;;  %v2029_v19 = vmov 0.0   ;;  %v1490_v20 = vld [vmem:[%s2387_s8 + $0x8] sm:$0xff]  ;;  %vm2030_vm4 = vmmov 0   ;;  %v1489_v21 = vld [vmem:[%s2387_s8] sm:$0xff] }
 0x888   : > { %1924 = vmatprep.subr.mxu0 %v2029_v19  ;;  %1930 = vmatprep.mubr.msk.f32.mxu0 %vm2030_vm4, %v2029_v19  ;;  %v1737_v24 = vld [vmem:[%s2388_s9] ss:$0 sm:$0xff] }
 0x889   : > { %1925 = vmatpush3.msk.msra.mxu0 %vm453_vm1, %v1491_v18 }
 0x88a   : > { %1926 = vmatprep.subr.mxu0 %v2029_v19 }
 0x88b   : > { %1927 = vmatpush3.msra.mxu0 %v1490_v20 }
 0x88c   : > { %1928 = vmatprep.subr.mxu0 %v2029_v19 }
 0x88d   : > { %1929 = vmatpush3.msra.mxu0 %v1489_v21 }
 0x88e   : > { %1931 = vmatmul.mubr.msk.f32.vlgmr.msra.gmra.mxu0 %vm446_vm2, %v1482_v15 }
 0x94e   : > { %v1571_v25 = vpop.f32.mrf.mxu0 }
 0x94f   : > { %v1572_v28 = vadd.f32 %v1737_v24, %v1571_v25 }
 0x950   : > { %v1932_v29 = vpop.f32.mrf.mxu0 }
 0x951   : > { %1575 = vst [vmem:[#allocation3] sm:$0xff] %v1572_v28 }
 0x952 PF: > { %p1940_p6 = scmp.eq.s32.totalorder %s2093_s14, 5  ;;  %s2031_s19 = smov [#allocation3]  }
 0x953   : > { %s1583_s20 = sshll.u32 %s2031_s19, 4  ;;  %s1584_s20 = int_to_ptr.vmem [resolvable:$true] %s1583_s20 }
 0x954   : > { %s1993_s18 = scalar_lea.vmem %s1584_s20, 128  ;;  %p2000_p10 = scmp.lt.s32.totalorder %s1584_s20, %s1584_s20 }
 0x955   : > { %p1994_p7 = scmp.ne.s32.totalorder %s1584_s20, %s1993_s18  ;;  %p2001_p11 = scmp.lt.s32.totalorder %s1993_s18, %s1993_s18 }
 0x957   : > { %p1995_p8 = pnand %p1994_p7, %p1940_p6  ;;  %p2002_p12 = por %p2001_p11, %p2000_p10 }
 0x959   : > { %p1996_p9 = pneg %p1995_p8 }
 0x95b   : > { %p2003_p13 = pnand %p2002_p12, %p1996_p9 }
 0x95d   : > { %2006 = shalt.err (!%p2003_p13)
}
 0x95e   : > { %1937 = dma.vmem_to_hbm [thread:$0]  (%p1940_p6), %s1584_s20, 128, %s2389_s10, [#allocation4]  }
 0x95f   : > { %2022 = dma.done.wait (%p1940_p6), [#allocation4], 128  }
 0x960   : > { %2024 = vsyncadd (%p1940_p6), [#allocation4], 4294967168 }
 0x961 PF: > { %s2392_s23 = sld [smem:[#allocation6_spill]] }
 0x967   : > { %s21_s13 = sadd.s32 1, %s2392_s23  }
 0x968   : > { %p18_p0 = scmp.ge.s32.totalorder %s21_s13, 8  }
 0x96a   :  { %20 = sbr.rel (!%p18_p0) target bundleno = 1 (0x1), region = 118 }
 0x96f   :  { %1596 = vsyncpa [#allocation4], 1 }
 0x970   :  { %1598 = vsyncpa [#allocation4 + $0x1], 1 }

</bundles_post_ra>
